<compile_context>
chip_gen: v6e
topology: v6e:2x2x1
jax: 0.10.0
libtpu: 0.0.40
codegen_flags: <defaults>
</compile_context>

<pallas_src>
from math import sqrt

import jax
import jax.numpy as jnp
from jax.experimental import pallas as pl
from jax.experimental.pallas import tpu as pltpu


def _attention_kernel(feat_ref, hid_ref, mask_ref, w_ref, b_ref,
                      res_ref, alpha_ref):
    feat = feat_ref[...].astype(jnp.float32)              # (TB, L, D) f32
    hid = hid_ref[...].astype(jnp.float32)                # (TB, H)
    mask = mask_ref[...].astype(jnp.float32)              # (TB, L) lane-dense
    w = w_ref[...].astype(jnp.float32)                    # (H, D)
    b = b_ref[...].astype(jnp.float32)                    # (1, D)

    inv_sqrt_d = jnp.float32(1.0 / sqrt(float(feat.shape[-1])))

    # Projection hidden -> feature space on the MXU (f32 accumulation); fold
    # the 1/sqrt(D) scale into the (TB, D) projection instead of the (TB, L)
    # scores (fewer VALU ops, off the softmax critical path).
    proj = (jnp.dot(hid, w, preferred_element_type=jnp.float32) + b) * inv_sqrt_d

    # Scores: VPU broadcast-multiply + XLU lane reduce over D, exact f32.
    # (The degenerate (L,D)x(D,1) batched matmul wasted MXU issue slots and
    # lost precision; the review's suggested VPU path is used instead.)
    scores = jnp.sum(feat * proj[:, None, :], axis=-1)     # (TB, L)

    # Masked, numerically stable softmax over the length axis (f32).
    neg = jnp.finfo(jnp.float32).min
    masked = jnp.where(mask > 0, scores, neg)
    m = jnp.max(masked, axis=-1, keepdims=True)             # (TB, 1)
    e = jnp.exp(masked - m) * mask                           # (TB, L)
    denom = jnp.sum(e, axis=-1, keepdims=True)               # (TB, 1)
    # Exact divide; the guard keeps fully-masked / padded rows finite (zeros).
    alpha = e / jnp.maximum(denom, jnp.float32(1e-30))       # (TB, L)

    # Attention-weighted sum over L: broadcast-multiply + sublane reduce, f32.
    res = jnp.sum(alpha[:, :, None] * feat, axis=1)           # (TB, D)

    res_ref[...] = res.astype(res_ref.dtype)
    alpha_ref[...] = alpha.astype(alpha_ref.dtype)


def _pick_batch_tile(B, L, D, H, feat_bytes, hid_bytes, mask_bytes,
                     param_bytes, tile_budget_bytes):
    """Largest batch tile whose double-buffered blocks + f32 temporaries fit."""
    per_row = (2 * L * D * feat_bytes          # feature (double-buffered)
               + 2 * H * hid_bytes             # hidden
               + 2 * L * mask_bytes            # mask
               + 2 * D * 4 + 2 * L * 4         # res / alpha output blocks
               + 3 * L * D * 4                 # in-kernel f32 temporaries
               + 8 * (L + D))                  # small per-row vectors
    fixed = 2 * (H * D + D) * param_bytes      # replicated W / b blocks
    return int((tile_budget_bytes - fixed) // max(per_row, 1))


def attention_forward(feature, hidden, mask, w, b, *, batch_tile=None):
    """feature (B,L,D), hidden (B,H), mask (B,L,1), w (H,D), b (1,D)
    -> (res (B,D) f32, alpha (B,L) f32)."""
    B, L, D = feature.shape
    H = hidden.shape[1]

    # Lane-dense mask: squeeze the trailing singleton before the kernel.
    mask2d = mask[..., 0]                                            # (B, L)

    # Generation-aware VMEM budget (v5e/v6e 128 MiB phys, v7x 64 MiB).
    try:
        vmem_phys = int(pltpu.get_tpu_info().vmem_capacity_bytes)
    except Exception:  # non-TPU backend / interpret mode: be conservative
        vmem_phys = 64 * 1024 * 1024
    vmem_limit = int(min(0.75 * vmem_phys, 112 * 1024 * 1024))   # 96 / 48 MiB
    tile_budget = int(0.7 * vmem_limit)      # headroom for compiler scratch

    if batch_tile is None:
        tb = _pick_batch_tile(B, L, D, H,
                              feature.dtype.itemsize, hidden.dtype.itemsize,
                              mask2d.dtype.itemsize, w.dtype.itemsize,
                              tile_budget)
    else:
        tb = int(batch_tile)
    tb = max(1, min(tb, B))
    if tb < B:
        # Sublane-align the tile; tb < B ⇒ >=2 grid steps, so the feature DMA
        # pipelines and both TensorCores get work on v7x ("parallel" axis).
        tb = min(max(8, (tb // 8) * 8), B)
    TB = tb
    grid = (pl.cdiv(B, TB),)

    out_bytes = B * D * 4 + B * L * 4
    cost = pl.CostEstimate(
        flops=2 * B * H * D + 4 * B * L * D + 8 * B * L,
        transcendentals=B * L,
        bytes_accessed=int(feature.nbytes + hidden.nbytes + mask2d.nbytes
                           + w.nbytes + b.nbytes + out_bytes),
    )

    grid_spec = pl.GridSpec(
        grid=grid,
        in_specs=[
            pl.BlockSpec((TB, L, D), lambda i: (i, 0, 0)),   # feature
            pl.BlockSpec((TB, H), lambda i: (i, 0)),          # hidden
            pl.BlockSpec((TB, L), lambda i: (i, 0)),          # mask (lane-dense)
            pl.BlockSpec((H, D), lambda i: (0, 0)),            # W (replicated)
            pl.BlockSpec((1, D), lambda i: (0, 0)),            # b (replicated)
        ],
        out_specs=[
            pl.BlockSpec((TB, D), lambda i: (i, 0)),           # res
            pl.BlockSpec((TB, L), lambda i: (i, 0)),           # alpha
        ],
    )

    return pl.pallas_call(
        _attention_kernel,
        grid_spec=grid_spec,
        out_shape=(
            jax.ShapeDtypeStruct((B, D), jnp.float32),
            jax.ShapeDtypeStruct((B, L), jnp.float32),
        ),
        compiler_params=pltpu.CompilerParams(
            # Batch tiles are fully independent -> shard across TCs on v7x.
            dimension_semantics=("parallel",),
            vmem_limit_bytes=vmem_limit,
        ),
        cost_estimate=cost,
    )(feature, hidden, mask2d, w, b)


def attention_reference(feature, hidden, mask, w, b):
    """Plain-JAX reference for correctness checking."""
    d = feature.shape[-1]
    proj = hidden.astype(jnp.float32) @ w.astype(jnp.float32) + b.astype(jnp.float32)
    scores = jnp.sum(feature.astype(jnp.float32) * proj[:, None, :],
                     axis=-1) / sqrt(float(d))
    mask2 = mask[..., 0].astype(jnp.float32)
    neg = jnp.finfo(jnp.float32).min
    masked_scores = jnp.where(mask2 > 0, scores, neg)
    m = jnp.max(masked_scores, axis=-1, keepdims=True)
    e = jnp.exp(masked_scores - m) * mask2
    alpha = e / jnp.sum(e, axis=-1, keepdims=True)
    res = jnp.sum(alpha[:, :, None] * feature.astype(jnp.float32), axis=1)
    return res, alpha


if __name__ == "__main__":
    # Small but multi-tile shapes: batch=16 with batch_tile=8 -> grid=(2,).
    batch, length, feature_dim, hidden_dim = 16, 8, 32, 16

    key = jax.random.PRNGKey(0)
    k_feat, k_hid, k_mask, k_w, k_b = jax.random.split(key, 5)

    feature = jax.random.normal(k_feat, (batch, length, feature_dim),
                                dtype=jnp.float32)
    hidden = jax.random.normal(k_hid, (batch, hidden_dim), dtype=jnp.float32)
    # Binary mask with a few masked-out positions (keep at least one valid).
    mask_bits = (jax.random.uniform(k_mask, (batch, length)) > 0.25)
    mask_bits = mask_bits.at[:, 0].set(True)
    mask = mask_bits.astype(jnp.float32)[..., None]          # (B, L, 1)

    # Deterministic parameter init (projection hidden_dim -> feature_dim).
    w = (jax.random.normal(k_w, (hidden_dim, feature_dim), dtype=jnp.float32)
         / sqrt(float(hidden_dim)))
    b = jax.random.normal(k_b, (1, feature_dim), dtype=jnp.float32) * 0.01

    res, alpha = attention_forward(feature, hidden, mask, w, b, batch_tile=8)
    res, alpha = jax.block_until_ready((res, alpha))

    res_ref, alpha_ref = attention_reference(feature, hidden, mask, w, b)
    assert res.shape == (batch, feature_dim)
    assert alpha.shape == (batch, length)
    # Scores, softmax and the weighted sum are exact f32 in both kernel and
    # reference; the tolerance only has to cover the (tiny) projection matmul,
    # whose MXU f32 passes may differ from XLA's default f32 dot precision.
    assert jnp.allclose(res, res_ref, atol=2e-2, rtol=2e-2), \
        float(jnp.max(jnp.abs(res - res_ref)))
    assert jnp.allclose(alpha, alpha_ref, atol=2e-2, rtol=2e-2), \
        float(jnp.max(jnp.abs(alpha - alpha_ref)))
    # Structural checks: rows sum to 1, masked positions get exactly 0 weight.
    assert jnp.allclose(jnp.sum(alpha, axis=-1), 1.0, atol=1e-4)
    assert jnp.allclose(alpha * (1.0 - mask[..., 0]), 0.0, atol=1e-6)

    print("KERNEL_OK")
</pallas_src>

<mosaic_0001>
module attributes {stable_mosaic.version = 11 : i64} {
  func.func @_attention_kernel(%arg0: i32, %arg1: memref<8x8x32xf32, #tpu.memory_space<vmem>>, %arg2: memref<8x16xf32, #tpu.memory_space<vmem>>, %arg3: memref<8x8xf32, #tpu.memory_space<vmem>>, %arg4: memref<16x32xf32, #tpu.memory_space<vmem>>, %arg5: memref<1x32xf32, #tpu.memory_space<vmem>>, %arg6: memref<8x32xf32, #tpu.memory_space<vmem>>, %arg7: memref<8x8xf32, #tpu.memory_space<vmem>>) attributes {dimension_semantics = [#tpu.dimension_semantics<parallel>], iteration_bounds = array<i64: 2>, scalar_prefetch = 0 : i64, scratch_operands = 0 : i64, tpu.core_type = #tpu.core_type<tc>, window_params = [{transform_indices = @transform_0, window_bounds = array<i64: 8, 8, 32>}, {transform_indices = @transform_1, window_bounds = array<i64: 8, 16>}, {transform_indices = @transform_2, window_bounds = array<i64: 8, 8>}, {pipeline_mode = #tpu.pipeline_mode<synchronous>, transform_indices = @transform_3, window_bounds = array<i64: 16, 32>}, {pipeline_mode = #tpu.pipeline_mode<synchronous>, transform_indices = @transform_4, window_bounds = array<i64: 1, 32>}, {transform_indices = @transform_5, window_bounds = array<i64: 8, 32>}, {transform_indices = @transform_6, window_bounds = array<i64: 8, 8>}]} {
    %c0 = arith.constant 0 : index
    %c0_0 = arith.constant 0 : index
    %c0_1 = arith.constant 0 : index
    %0 = vector.load %arg1[%c0, %c0_0, %c0_1] : memref<8x8x32xf32, #tpu.memory_space<vmem>>, vector<8x8x32xf32>
    %c0_2 = arith.constant 0 : index
    %c0_3 = arith.constant 0 : index
    %1 = vector.load %arg2[%c0_2, %c0_3] : memref<8x16xf32, #tpu.memory_space<vmem>>, vector<8x16xf32>
    %c0_4 = arith.constant 0 : index
    %c0_5 = arith.constant 0 : index
    %2 = vector.load %arg3[%c0_4, %c0_5] : memref<8x8xf32, #tpu.memory_space<vmem>>, vector<8x8xf32>
    %c0_6 = arith.constant 0 : index
    %c0_7 = arith.constant 0 : index
    %3 = vector.load %arg4[%c0_6, %c0_7] : memref<16x32xf32, #tpu.memory_space<vmem>>, vector<16x32xf32>
    %c0_8 = arith.constant 0 : index
    %c0_9 = arith.constant 0 : index
    %4 = vector.load %arg5[%c0_8, %c0_9] : memref<1x32xf32, #tpu.memory_space<vmem>>, vector<1x32xf32>
    %cst = arith.constant dense<0.000000e+00> : vector<8x32xf32>
    %5 = tpu.matmul %1, %3, %cst {dimension_numbers = #tpu.dot_dimension_numbers<[1], [0], [0], [1], [0, 0, 1, 1], [], []>} : vector<8x16xf32>, vector<16x32xf32>, vector<8x32xf32> -> vector<8x32xf32>
    %6 = vector.broadcast %4 : vector<1x32xf32> to vector<8x32xf32>
    %7 = arith.addf %5, %6 : vector<8x32xf32>
    %cst_10 = arith.constant 0.176776692 : f32
    %8 = vector.broadcast %cst_10 : f32 to vector<8x32xf32>
    %9 = arith.mulf %7, %8 : vector<8x32xf32>
    %10 = vector.shape_cast %9 : vector<8x32xf32> to vector<8x1x32xf32>
    %11 = vector.broadcast %10 : vector<8x1x32xf32> to vector<8x8x32xf32>
    %12 = arith.mulf %0, %11 : vector<8x8x32xf32>
    %cst_11 = arith.constant dense<0.000000e+00> : vector<8x8xf32>
    %13 = vector.multi_reduction <add>, %12, %cst_11 [2] : vector<8x8x32xf32> to vector<8x8xf32>
    %cst_12 = arith.constant 0.000000e+00 : f32
    %14 = vector.broadcast %cst_12 : f32 to vector<8x8xf32>
    %15 = arith.cmpf ogt, %2, %14 : vector<8x8xf32>
    %cst_13 = arith.constant -3.40282347E+38 : f32
    %16 = vector.broadcast %cst_13 : f32 to vector<8x8xf32>
    %17 = arith.select %15, %13, %16 : vector<8x8xi1>, vector<8x8xf32>
    %cst_14 = arith.constant dense<0xFF800000> : vector<8xf32>
    %18 = vector.multi_reduction <maximumf>, %17, %cst_14 [1] : vector<8x8xf32> to vector<8xf32>
    %19 = vector.shape_cast %18 : vector<8xf32> to vector<8x1xf32>
    %20 = vector.broadcast %19 : vector<8x1xf32> to vector<8x8xf32>
    %21 = arith.subf %17, %20 : vector<8x8xf32>
    %22 = math.exp %21 : vector<8x8xf32>
    %23 = arith.mulf %22, %2 : vector<8x8xf32>
    %cst_15 = arith.constant dense<0.000000e+00> : vector<8xf32>
    %24 = vector.multi_reduction <add>, %23, %cst_15 [1] : vector<8x8xf32> to vector<8xf32>
    %25 = vector.shape_cast %24 : vector<8xf32> to vector<8x1xf32>
    %cst_16 = arith.constant 1.000000e-30 : f32
    %26 = vector.broadcast %cst_16 : f32 to vector<8x1xf32>
    %27 = arith.maximumf %25, %26 : vector<8x1xf32>
    %28 = vector.broadcast %27 : vector<8x1xf32> to vector<8x8xf32>
    %29 = arith.divf %23, %28 : vector<8x8xf32>
    %30 = vector.shape_cast %29 : vector<8x8xf32> to vector<8x8x1xf32>
    %31 = vector.broadcast %30 : vector<8x8x1xf32> to vector<8x8x32xf32>
    %32 = arith.mulf %31, %0 : vector<8x8x32xf32>
    %cst_17 = arith.constant dense<0.000000e+00> : vector<8x32xf32>
    %33 = vector.multi_reduction <add>, %32, %cst_17 [1] : vector<8x8x32xf32> to vector<8x32xf32>
    %c0_18 = arith.constant 0 : index
    %c0_19 = arith.constant 0 : index
    %34 = vector.load %arg6[%c0_18, %c0_19] : memref<8x32xf32, #tpu.memory_space<vmem>>, vector<8x32xf32>
    tpu.vector_store %arg6[%c0_18, %c0_19], %33 {strides = array<i32>} : memref<8x32xf32, #tpu.memory_space<vmem>>, vector<8x32xf32>,
    %c0_20 = arith.constant 0 : index
    %c0_21 = arith.constant 0 : index
    %35 = vector.load %arg7[%c0_20, %c0_21] : memref<8x8xf32, #tpu.memory_space<vmem>>, vector<8x8xf32>
    tpu.vector_store %arg7[%c0_20, %c0_21], %29 {strides = array<i32>} : memref<8x8xf32, #tpu.memory_space<vmem>>, vector<8x8xf32>,
    return
  }
  func.func @transform_0(%arg0: i32) -> (i32, i32, i32) {
    %c0_i32 = arith.constant 0 : i32
    %c0_i32_0 = arith.constant 0 : i32
    %c0_i32_1 = arith.constant 0 : i32
    return %arg0, %c0_i32, %c0_i32_0 : i32, i32, i32
  }
  func.func @transform_1(%arg0: i32) -> (i32, i32) {
    %c0_i32 = arith.constant 0 : i32
    %c0_i32_0 = arith.constant 0 : i32
    return %arg0, %c0_i32 : i32, i32
  }
  func.func @transform_2(%arg0: i32) -> (i32, i32) {
    %c0_i32 = arith.constant 0 : i32
    %c0_i32_0 = arith.constant 0 : i32
    return %arg0, %c0_i32 : i32, i32
  }
  func.func @transform_3(%arg0: i32) -> (i32, i32) {
    %c0_i32 = arith.constant 0 : i32
    %c0_i32_0 = arith.constant 0 : i32
    %c0_i32_1 = arith.constant 0 : i32
    return %c0_i32, %c0_i32_0 : i32, i32
  }
  func.func @transform_4(%arg0: i32) -> (i32, i32) {
    %c0_i32 = arith.constant 0 : i32
    %c0_i32_0 = arith.constant 0 : i32
    %c0_i32_1 = arith.constant 0 : i32
    return %c0_i32, %c0_i32_0 : i32, i32
  }
  func.func @transform_5(%arg0: i32) -> (i32, i32) {
    %c0_i32 = arith.constant 0 : i32
    %c0_i32_0 = arith.constant 0 : i32
    return %arg0, %c0_i32 : i32, i32
  }
  func.func @transform_6(%arg0: i32) -> (i32, i32) {
    %c0_i32 = arith.constant 0 : i32
    %c0_i32_0 = arith.constant 0 : i32
    return %arg0, %c0_i32 : i32, i32
  }
}

</mosaic_0001>

<bundles_post_ra>
// kernel: tpu_custom_call.1
= control target key start
LH: loop header
LB: loop body
LE: loop exit
PB: predicated region body
PF: predicated region fallthrough
CT: control target
= control target key end

     0   :  { %12 = vsyncpa [#allocation3], 0  ;;  %s1468_s0 = inlined_call_operand.hbm [shape: f32[16,8,32], index: 0, kind: input, shape index: {}]   ;;  %s1469_s1 = inlined_call_operand.vmem [shape: f32[16,16], index: 1, kind: input, shape index: {}]   ;;  %s1470_s2 = inlined_call_operand.vmem [shape: f32[16,8], index: 2, kind: input, shape index: {}]   ;;  %s1471_s3 = inlined_call_operand.hbm [shape: f32[16,32], index: 3, kind: input, shape index: {}]   ;;  %s1472_s4 = inlined_call_operand.vmem [shape: f32[1,32], index: 4, kind: input, shape index: {}]   ;;  %s1473_s5 = inlined_call_operand.hbm [shape: f32[16,32], index: 5, kind: output, shape index: {0}]   ;;  %s1474_s6 = inlined_call_operand.vmem [shape: f32[16,8], index: 6, kind: output, shape index: {1}]  }
   0x1   :  { %14 = vsyncpa [#allocation3 + $0x1], 0 }
   0x2   :  { %15 = vsyncpa [#allocation6], 0 }
   0x3   :  { %16 = vsyncpa [#allocation4], 0 }
   0x4   :  { %18 = vsyncpa [#allocation4 + $0x1], 0  ;;  %s1172_s21 = smov 0   ;;  %s1174_s22 = smov 0  }
   0x5   :  { %s1176_s23 = smov 0   ;;  %s1178_s24 = smov 0  }
   0x6 LB: > { %s1193_s25 = sadd.s32 4294967295, %s1127_s24   ;;  %s908_s26 = sadd.s32 4294967294, %s1127_s24   ;;  %s1127_s24 = sphi %s1178_s24, %s1500_s24   ;;  %s1123_s23 = sphi %s1176_s23, %s1499_s23   ;;  %s1119_s22 = sphi %s1174_s22, %s1498_s22   ;;  %s1115_s21 = sphi %s1172_s21, %s1497_s21  }
   0x7   : > { %p44_p0 = scmp.ne.s32.totalorder %s1119_s22, %s1115_s21  ;;  %p1475_p1 = scmp.eq.s32.totalorder %s1193_s25, 0 }
   0x8   : > { %p168_p3 = scmp.eq.s32.totalorder %s908_s26, 1  ;;  %p909_p5 = scmp.ge.s32.totalorder %s1127_s24, 1 }
   0x9   : > { %p1202_p4 = por %p1475_p1, %p44_p0  ;;  %p201_p7 = scmp.lt.s32.totalorder %s1127_s24, 3 }
   0xa   : > { %p1207_p6 = por %p168_p3, %p44_p0  ;;  %s1129_s30 = smov [#allocation5]  }
   0xb   : > { %s1481_s27 = scalar_select %p1202_p4, 1, 0 }
   0xc   : > { %s1482_s28 = scalar_select %p1207_p6, 1, 0 }
   0xd   : > { %p1212_p8 = pnand %p909_p5, %p201_p7  ;;  %s213_s7 = sshll.u32 %s1129_s30, 4  ;;  %s214_s7 = int_to_ptr.vmem [resolvable:$true] %s213_s7 }
   0xe   : > { %s1226_s9 = sadd.s32 1, %s1127_s24   ;;  %s31_s10 = sadd.s32 1, %s1123_s23 }
   0xf   : > { %s1483_s29 = scalar_select %p1212_p8, 1, 0 }
  0x10   : > { %p947_p9 = pneg %p1212_p8  ;;  %s28_s11 = ssub.s32 %s1127_s24, %s1226_s9 }
  0x11   : > { %s1016_s12 = scalar_lea.vmem %s214_s7, 256  ;;  %p1024_p5 = scmp.lt.s32.totalorder %s214_s7, %s214_s7 }
  0x12   : > { %p1221_p11 = pnand %p947_p9, %p1475_p1  ;;  %p1017_p13 = scmp.ne.s32.totalorder %s214_s7, %s1016_s12 }
  0x13   : > { %p1025_p7 = scmp.lt.s32.totalorder %s1016_s12, %s1016_s12 }
  0x14   : > { %p1007_p12 = pneg %p1221_p11 }
  0x15   : > { %p1026_p10 = por %p1025_p7, %p1024_p5 }
  0x16   : > { %p1019_p0 = pnand %p1017_p13, %p1007_p12 }
  0x18   : > { %p1020_p3 = pneg %p1019_p0 }
  0x1a   : > { %p1027_p2 = pnand %p1026_p10, %p1020_p3 }
  0x1c   : > { %1030 = shalt.err (!%p1027_p2)
}
  0x1d   : > { %s1476_s13 = smov 128   ;;  %s1477_s14 = smov 8  }
  0x1e   : > { %950 = dma.hbm_to_vmem [thread:$0]  (!%p1221_p11), %s1471_s3, 256, %s214_s7, [#allocation6], %s1476_s13, %s1476_s13, %s1477_s14  }
  0x1f   : > { %p29_p2 = scmp.eq.s32.totalorder %s28_s11, 0  ;;  %p38_p9 = scmp.ne.s32.totalorder %s1123_s23, %s1119_s22 }
  0x20   : > { %p39_p10 = scmp.eq.s32.totalorder %s1127_s24, 0  ;;  %p960_p12 = scmp.lt.s32.totalorder %s1127_s24, 2 }
  0x21   : > { %s1246_s17 = scalar_select %p29_p2, %s1123_s23, %s31_s10  }
  0x22   : > { %p40_p13 = por %p39_p10, %p38_p9  ;;  %p1485_p0 = scmp.eq.s32.totalorder %s1193_s25, 1 }
  0x23   : > { %s230_s19 = sand.u32 1, %s1123_s23   ;;  %s928_s20 = sshll.u32 %s1127_s24, 10 }
  0x24   : > { %p1250_p3 = por %p1485_p0, %p38_p9  ;;  %s912_s26 = sshll.u32 %s230_s19, 6 }
  0x25   : > { %s1259_s12 = scalar_lea.hbm %s1468_s0, %s928_s20  ;;  %s234_s7 = scalar_lea.vmem [#allocation2], %s912_s26 }
  0x26   : > { %s1486_s18 = scalar_select %p1250_p3, 1, 0 }
  0x27   : > { %s241_s10 = sshll.u32 %s234_s7, 4  ;;  %p1261_p11 = pnand %p960_p12, %p40_p13  ;;  %s1265_s10 = int_to_ptr.vmem [resolvable:$true] %s241_s10 }
  0x28   : > { %s1267_s15 = scalar_lea.sflag [#allocation3], %s230_s19  ;;  %s1031_s16 = scalar_lea.hbm %s1259_s12, 1024 }
  0x29   : > { %p1032_p5 = scmp.ne.s32.totalorder %s1259_s12, %s1031_s16  ;;  %p1033_p7 = pneg %p1261_p11 }
  0x2a   : > { %s1036_s26 = scalar_lea.hbm %s1468_s0, 2048  ;;  %p1037_p10 = scmp.lt.s32.totalorder %s1259_s12, %s1468_s0 }
  0x2b   : > { %p1034_p2 = pnand %p1033_p7, %p1032_p5  ;;  %p1038_p12 = scmp.lt.s32.totalorder %s1036_s26, %s1031_s16 }
  0x2d   : > { %p1035_p9 = pneg %p1034_p2  ;;  %p1039_p13 = por %p1038_p12, %p1037_p10 }
  0x2f   : > { %p1040_p0 = pnand %p1039_p13, %p1035_p9 }
  0x31   : > { %1043 = shalt.err (!%p1040_p0)
}
  0x32   : > { %s1044_s19 = scalar_lea.vmem %s1265_s10, 1024  ;;  %s1132_s13 = smov [#allocation2]  }
  0x33   : > { %p1045_p1 = scmp.ne.s32.totalorder %s1265_s10, %s1044_s19  ;;  %s1049_s14 = sshll.u32 %s1132_s13, 4  ;;  %s1050_s14 = int_to_ptr.vmem [resolvable:$false] %s1049_s14 }
  0x34   : > { %s1051_s20 = scalar_lea.vmem %s1050_s14, 2048  ;;  %p1052_p2 = scmp.lt.s32.totalorder %s1265_s10, %s1050_s14 }
  0x35   : > { %p1047_p6 = pnand %p1045_p1, %p1033_p7  ;;  %p1053_p3 = scmp.lt.s32.totalorder %s1051_s20, %s1044_s19 }
  0x37   : > { %p1048_p5 = pneg %p1047_p6  ;;  %p1054_p4 = por %p1053_p3, %p1052_p2 }
  0x39   : > { %p1055_p8 = pnand %p1054_p4, %p1048_p5 }
  0x3b   : > { %1058 = shalt.err (!%p1055_p8)
}
  0x3c   : > { %s1488_s16 = smov 8   ;;  %s1489_s30 = smov 128  }
  0x3d   : > { %954 = dma.hbm_to_vmem [thread:$0]  (!%p1261_p11), %s1259_s12, 1024, %s1265_s10, %s1267_s15, %s1489_s30, %s1489_s30, %s1488_s16  }
  0x3e   : > { %p1490_p1 = scmp.ne.s32.totalorder %s1483_s29, 0 }
  0x3f   : > { %s1294_s13 = sand.u32 (!%p1490_p1), 1, %s1119_s22   ;;  %p1491_p4 = scmp.ne.s32.totalorder (!%p1490_p1), %s1481_s27, 0 }
  0x40   : > { %267 = sbr.rel (%p1490_p1) target bundleno = 920 (0x398), region = 40  ;;  %s916_s14 = sshll.u32 (!%p1490_p1), %s1294_s13, 6 }
  0x41   : > { %s270_s26 = scalar_lea.sflag (!%p1490_p1), [#allocation3], %s1294_s13  ;;  %s1298_s8 = scalar_lea.vmem (!%p1490_p1), [#allocation2], %s916_s14 }
  0x45   : > { %1102 = dma.done.wait (%p1491_p4), %s270_s26, 1024  }
  0x46   : > { %1104 = vsyncadd (%p1491_p4), %s270_s26, 4294966272  ;;  %p1492_p6 = scmp.eq.s32.totalorder %s1193_s25, 0 }
  0x48   : > { %1106 = dma.done.wait (%p1492_p6), [#allocation6], 256   ;;  %p1493_p8 = pmov %p1492_p6 }
  0x49   : > { %p319_p3 = scmp.lt.s32.totalorder %s1193_s25, 1  ;;  %v1133_v0 = vmov 0.0   ;;  %vm1134_vm0 = vmmov 0   ;;  %v342_v1 = vld [vmem:[#allocation5 + $0x8] sm:$0xff]  ;;  %v341_v2 = vld [vmem:[#allocation5] sm:$0xff]  ;;  %vm350_vm1 = vcmask 130048   ;;  %v430_v6 = vlaneseq }
  0x4a   : > { %1108 = vsyncadd (%p1493_p8), [#allocation6], 4294967040  ;;  %932 = vmatprep.subr.mxu0 %v1133_v0  ;;  %936 = vmatprep.mubr.msk.f32.mxu0 %vm1134_vm0, %v1133_v0  ;;  %v1135_v4 = vmov 1966171168   ;;  %v922_v9 = vld [vmem:[%s1472_s4] ss:$0 sm:$0xff] }
  0x4b   : > { %s320_s29 = scalar_select %p319_p3, %s1193_s25, 1  ;;  %933 = vmatpush3.msra.mxu0 %v342_v1  ;;  %v428_v5 = vunpack.c.l.s4 %v1135_v4  ;;  %v1317_v8 = vshrl.u32 %v430_v6, 7  ;;  %v1327_v21 = vld [vmem:[%s1298_s8] sm:$0xff]  ;;  %vm523_vm2 = vcmask 261120   ;;  %v1331_v26 = vld [vmem:[%s1298_s8 + $0x10] sm:$0xff]  ;;  %v1334_v27 = vld [vmem:[%s1298_s8 + $0x8] sm:$0xff] }
  0x4c   : > { %934 = vmatprep.subr.mxu0 %v1133_v0  ;;  %v1340_v33 = vld [vmem:[%s1298_s8 + $0x18] sm:$0xff]  ;;  %v1348_v41 = vld [vmem:[%s1298_s8 + $0x20] sm:$0xff]  ;;  %v1354_v46 = vld [vmem:[%s1298_s8 + $0x28] sm:$0xff]  ;;  %v558_v61 = vand.u32 127, %v430_v6  ;;  %vm591_vm3 = vcmask 1041409   ;;  %vm593_vm4 = vcmask 1042434  }
  0x4d   : > { %s1310_s12 = sshll.u32 %s320_s29, 3  ;;  %935 = vmatpush3.msra.mxu0 %v341_v2  ;;  %v429_v7 = vunpack.c.0.s8 %v428_v5  ;;  %v1324_v17 = vsub.s32 0, %v1317_v8  ;;  %v1360_v50 = vld [vmem:[%s1298_s8 + $0x30] sm:$0xff]  ;;  %v1366_v54 = vld [vmem:[%s1298_s8 + $0x38] sm:$0xff]  ;;  %vm595_vm5 = vcmask 1043459   ;;  %vm597_vm6 = vcmask 1044484  }
  0x4e   : > { %s322_s11 = scalar_lea.vmem %s1469_s1, %s1310_s12  ;;  %v561_v63 = vsub.s32 %v558_v61, %v1317_v8  ;;  %s326_s16 = scalar_lea.vmem %s1470_s2, %s1310_s12  ;;  %vm599_vm7 = vcmask 1045509   ;;  %vm601_vm8 = vcmask 1046534   ;;  %vm603_vm9 = vcmask 1047559  }
  0x4f   : > { %v339_v3 = vld [vmem:[%s322_s11] sm:$0xff]  ;;  %v432_v12 = vsub.s32 %v429_v7, %v1317_v8  ;;  %vm607_vm11 = vcmask 64512   ;;  %s330_s26 = scalar_lea.vmem %s1474_s6, %s1310_s12  ;;  %s918_s8 = sshll.u32 %s1294_s13, 3 }
  0x50   : > { %937 = vmatmul.mubr.msk.f32.vlgmr.msra.gmra.mxu0 %vm350_vm1, %v339_v3  ;;  %s925_s29 = sshll.u32 %s1193_s25, 7  ;;  %s311_s12 = scalar_lea.vmem [#allocation7], %s918_s8 }
  0x51   : > { %s777_s10 = sshll.u32 %s311_s12, 4  ;;  %s1429_s15 = scalar_lea.hbm %s1473_s5, %s925_s29  ;;  %s778_s10 = int_to_ptr.vmem [resolvable:$true] %s777_s10 }
  0x52   : > { %s760_s7 = scalar_lea.sflag [#allocation4], %s1294_s13  ;;  %s1059_s19 = scalar_lea.vmem %s778_s10, 128 }
  0x53   : > { %p1060_p11 = scmp.ne.s32.totalorder %s778_s10, %s1059_s19  ;;  %p1494_p7 = scmp.ne.s32.totalorder %s1486_s18, 0 }
  0x54   : > { %s1136_s25 = smov [#allocation7]  }
  0x55   : > { %p1061_p9 = pnand %p1060_p11, %p1494_p7  ;;  %s1063_s20 = sshll.u32 %s1136_s25, 4  ;;  %s1064_s20 = int_to_ptr.vmem [resolvable:$false] %s1063_s20 }
  0x56   : > { %p1066_p12 = scmp.lt.s32.totalorder %s778_s10, %s1064_s20 }
  0x57   : > { %p1062_p10 = pneg %p1061_p9 }
 0x110   : > { %v420_v10 = vpop.f32.mrf.mxu0 }
 0x111   : > { %v421_v11 = vadd.f32 %v922_v9, %v420_v10 }
 0x112   : > { %v938_v13 = vpop.f32.mrf.mxu0 }
 0x113   : > { %v424_v14 = vmul.f32 0.17677669, %v421_v11 }
 0x115   : > { %v426_v15 = vcombine.high %v424_v14, %v424_v14  ;;  %v433_v16 = vrot.slane %v424_v14, %v432_v12 }
 0x117   : > { %v440_v18 = vrot.slane %v426_v15, %v432_v12  ;;  %v441_v19 = vcombine.high %v433_v16, %v433_v16  ;;  %v449_v20 = vrot.slane %v433_v16, %v432_v12 }
 0x119   : > { %v442_v22 = vcombine.high %v440_v18, %v440_v18  ;;  %v478_v23 = vrot.slane %v449_v20, %v1324_v17  ;;  %v471_v24 = vcombine.high %v449_v20, %v449_v20  ;;  %v463_v25 = vrot.slane %v441_v19, %v432_v12 }
 0x11a   : > { %v456_v28 = vrot.slane %v440_v18, %v432_v12  ;;  %v340_v18 = vld [vmem:[%s326_s16] sm:$0xff]  ;;  %s1065_s16 = scalar_lea.vmem %s1064_s20, 256 }
 0x11b   : > { %v515_v29 = vmul.f32 %v478_v23, %v1327_v21  ;;  %v486_v30 = vrot.slane %v471_v24, %v1324_v17  ;;  %v482_v31 = vrot.slane %v463_v25, %v1324_v17  ;;  %v473_v32 = vcombine.high %v463_v25, %v463_v25  ;;  %p1067_p13 = scmp.lt.s32.totalorder %s1065_s16, %s1059_s19 }
 0x11c   : > { %v494_v34 = vrot.slane %v456_v28, %v1324_v17  ;;  %v470_v35 = vrot.slane %v442_v22, %v432_v12  ;;  %v472_v36 = vcombine.high %v456_v28, %v456_v28  ;;  %vm548_vm10 = vcmp.gt.f32.partialorder %v340_v18, 0.0 }
 0x11d   : > { %v524_v37 = vsel %vm523_vm2, %v515_v29, 0.0  ;;  %v517_v38 = vmul.f32 %v486_v30, %v1331_v26  ;;  %v516_v39 = vmul.f32 %v482_v31, %v1334_v27  ;;  %v490_v40 = vrot.slane %v473_v32, %v1324_v17  ;;  %p1068_p0 = por %p1067_p13, %p1066_p12 }
 0x11e   : > { %525 = vadd.xlane.f32.xlu0 %v524_v37  ;;  %v498_v44 = vrot.slane %v470_v35, %v1324_v17  ;;  %v474_v45 = vcombine.high %v470_v35, %v470_v35  ;;  %v519_v48 = vmul.f32 %v494_v34, %v1348_v41  ;;  %v502_v49 = vrot.slane %v472_v36, %v1324_v17 }
 0x11f   : > { %v530_v42 = vsel %vm523_vm2, %v517_v38, 0.0  ;;  %v518_v43 = vmul.f32 %v490_v40, %v1340_v33  ;;  %v527_v47 = vsel %vm523_vm2, %v516_v39, 0.0  ;;  %v630_v39 = vsub.s32 1, %v1317_v8  ;;  %p1069_p5 = pnand %p1068_p0, %p1062_p10 }
 0x120   : > { %531 = vadd.xlane.f32.xlu1 %v530_v42  ;;  %v520_v52 = vmul.f32 %v498_v44, %v1354_v46  ;;  %v506_v53 = vrot.slane %v474_v45, %v1324_v17  ;;  %v536_v55 = vsel %vm523_vm2, %v519_v48, 0.0  ;;  %v521_v56 = vmul.f32 %v502_v49, %v1360_v50 }
 0x121   : > { %v533_v51 = vsel %vm523_vm2, %v518_v43, 0.0  ;;  %v637_v45 = vsub.s32 2, %v1317_v8 }
 0x122   : > { %528 = vadd.xlane.f32.xlu0 %v527_v47  ;;  %v539_v57 = vsel %vm523_vm2, %v520_v52, 0.0  ;;  %v522_v58 = vmul.f32 %v506_v53, %v1366_v54  ;;  %v542_v59 = vsel %vm523_vm2, %v521_v56, 0.0  ;;  %v651_v47 = vsub.s32 4, %v1317_v8 }
 0x123   : > { %v665_v52 = vsub.s32 6, %v1317_v8  ;;  %v658_v56 = vsub.s32 5, %v1317_v8 }
 0x124   : > { %534 = vadd.xlane.f32.xlu1 %v533_v51  ;;  %v545_v60 = vsel %vm523_vm2, %v522_v58, 0.0  ;;  %v644_v51 = vsub.s32 3, %v1317_v8 }
 0x126   : > { %537 = vadd.xlane.f32.xlu0 %v536_v55 }
 0x128   : > { %540 = vadd.xlane.f32.xlu1 %v539_v57  ;;  %v672_v57 = vsub.s32 7, %v1317_v8 }
 0x12a   : > { %543 = vadd.xlane.f32.xlu0 %v542_v59 }
 0x12c   : > { %546 = vadd.xlane.f32.xlu1 %v545_v60 }
 0x1a7   : > { %v526_v62 = vpop.xlane.xlu0 %525 }
 0x1a8   : > { %v562_v2 = vrot.slane %v526_v62, %v561_v63 }
 0x1a9   : > { %v532_v0 = vpop.xlane.xlu1 %531 }
 0x1aa   : > { %v570_v4 = vrot.slane %v532_v0, %v561_v63 }
 0x1ab   : > { %v529_v1 = vpop.xlane.xlu0 %528 }
 0x1ac   : > { %v566_v3 = vrot.slane %v529_v1, %v561_v63 }
 0x1ad   : > { %v535_v5 = vpop.xlane.xlu1 %534 }
 0x1ae   : > { %v592_v7 = vsel %vm591_vm3, %v566_v3, %v562_v2  ;;  %v574_v9 = vrot.slane %v535_v5, %v561_v63 }
 0x1af   : > { %v594_v10 = vsel %vm593_vm4, %v570_v4, %v592_v7  ;;  %v538_v6 = vpop.xlane.xlu0 %537 }
 0x1b0   : > { %v596_v11 = vsel %vm595_vm5, %v574_v9, %v594_v10  ;;  %v578_v12 = vrot.slane %v538_v6, %v561_v63 }
 0x1b1   : > { %v541_v13 = vpop.xlane.xlu1 %540 }
 0x1b2   : > { %v598_v14 = vsel %vm597_vm6, %v578_v12, %v596_v11  ;;  %v582_v15 = vrot.slane %v541_v13, %v561_v63 }
 0x1b3   : > { %v544_v16 = vpop.xlane.xlu0 %543 }
 0x1b4   : > { %v600_v19 = vsel %vm599_vm7, %v582_v15, %v598_v14  ;;  %v586_v20 = vrot.slane %v544_v16, %v561_v63 }
 0x1b5   : > { %v547_v22 = vpop.xlane.xlu1 %546 }
 0x1b6   : > { %v590_v23 = vrot.slane %v547_v22, %v561_v63  ;;  %v602_v24 = vsel %vm601_vm8, %v586_v20, %v600_v19 }
 0x1b8   : > { %v604_v25 = vsel %vm603_vm9, %v590_v23, %v602_v24 }
 0x1b9   : > { %v606_v28 = vsel %vm548_vm10, %v604_v25, -3.4028235e+38 }
 0x1ba   : > { %v608_v29 = vsel %vm607_vm11, %v606_v28, -inf }
 0x1bb   : > { %609 = vmax.xlane.f32.xlu0 %v608_v29 }
 0x244   : > { %v610_v30 = vpop.xlane.xlu0 %609 }
 0x245   : > { %v611_v31 = vsub.f32 %v606_v28, %v610_v30 }
 0x247   : > { %v612_v32 = vmul.f32 1.442695, %v611_v31 }
 0x249   : > { %1001 = vpow2.f32 %v612_v32 }
 0x256   : > { %v1002_v34 = vpop.eup %1001 }
 0x257   : > { %v614_v35 = vmul.f32 %v1002_v34, %v340_v18 }
 0x259   : > { %v615_v36 = vsel %vm607_vm11, %v614_v35, 0.0 }
 0x25a   : > { %616 = vadd.xlane.f32.xlu1 %v615_v36 }
 0x2e3   : > { %v617_v37 = vpop.xlane.xlu1 %616 }
 0x2e4   : > { %v618_v38 = vmax.f32 %v617_v37, 1e-30 }
 0x2e6   : > { %1003 = vrcp.f32 %v618_v38 }
 0x2f3   : > { %v1004_v40 = vpop.eup %1003 }
 0x2f4   : > { %v620_v42 = vmul.f32 %v1004_v40, %v614_v35 }
 0x2f6   : > { %758 = vst.msk [vmem:[%s330_s26] sm:$0xff] %vm607_vm11, %v620_v42  ;;  %v631_v43 = vrot.slane %v620_v42, %v630_v39  ;;  %v624_v44 = vrot.slane %v620_v42, %v1324_v17  ;;  %v638_v48 = vrot.slane %v620_v42, %v637_v45  ;;  %v652_v49 = vrot.slane %v620_v42, %v651_v47 }
 0x2f7   : > { %v645_v53 = vrot.slane %v620_v42, %v644_v51  ;;  %v666_v55 = vrot.slane %v620_v42, %v665_v52  ;;  %v659_v17 = vrot.slane %v620_v42, %v658_v56  ;;  %v673_v58 = vrot.slane %v620_v42, %v672_v57 }
 0x2f8   : > { %633 = vbcast.lane.b32.xlu1 %v631_v43, 256  ;;  %626 = vbcast.lane.b32.xlu0 %v624_v44, 256 }
 0x2fc   : > { %640 = vbcast.lane.b32.xlu1 %v638_v48, 256  ;;  %654 = vbcast.lane.b32.xlu0 %v652_v49, 256 }
 0x300   : > { %647 = vbcast.lane.b32.xlu1 %v645_v53, 256  ;;  %668 = vbcast.lane.b32.xlu0 %v666_v55, 256 }
 0x304   : > { %661 = vbcast.lane.b32.xlu1 %v659_v17, 256 }
 0x308   : > { %675 = vbcast.lane.b32.xlu1 %v673_v58, 256 }
 0x36a   : > { %v634_v59 = vpop.permute.xlu1 %633  ;;  %v627_v60 = vpop.permute.xlu0 %626 }
 0x36b   : > { %v678_v61 = vmul.f32 %v634_v59, %v1334_v27  ;;  %v677_v62 = vmul.f32 %v627_v60, %v1327_v21 }
 0x36d   : > { %v692_v63 = vsel %vm523_vm2, %v678_v61, 0.0  ;;  %v685_v0 = vsel %vm523_vm2, %v677_v62, 0.0 }
 0x36e   : > { %v693_v1 = vrot.slane %v692_v63, 4  ;;  %v686_v2 = vrot.slane %v685_v0, 4  ;;  %v641_v3 = vpop.permute.xlu1 %640  ;;  %v655_v4 = vpop.permute.xlu0 %654 }
 0x36f   : > { %v679_v5 = vmul.f32 %v641_v3, %v1331_v26  ;;  %v681_v8 = vmul.f32 %v655_v4, %v1348_v41 }
 0x370   : > { %v694_v7 = vadd.f32 %v693_v1, %v692_v63  ;;  %v687_v9 = vadd.f32 %v686_v2, %v685_v0 }
 0x371   : > { %v699_v10 = vsel %vm523_vm2, %v679_v5, 0.0  ;;  %v713_v27 = vsel %vm523_vm2, %v681_v8, 0.0 }
 0x372   : > { %v695_v6 = vrot.slane %v694_v7, 2  ;;  %v688_v21 = vrot.slane %v687_v9, 2  ;;  %v700_v11 = vrot.slane %v699_v10, 4  ;;  %v714_v12 = vrot.slane %v713_v27, 4  ;;  %v648_v13 = vpop.permute.xlu1 %647  ;;  %v669_v14 = vpop.permute.xlu0 %668 }
 0x373   : > { %v680_v15 = vmul.f32 %v648_v13, %v1340_v33  ;;  %v683_v16 = vmul.f32 %v669_v14, %v1360_v50 }
 0x374   : > { %v696_v18 = vadd.f32 %v695_v6, %v694_v7  ;;  %v701_v26 = vadd.f32 %v700_v11, %v699_v10  ;;  %v715_v19 = vadd.f32 %v714_v12, %v713_v27  ;;  %v689_v41 = vadd.f32 %v688_v21, %v687_v9 }
 0x375   : > { %v706_v20 = vsel %vm523_vm2, %v680_v15, 0.0  ;;  %v727_v22 = vsel %vm523_vm2, %v683_v16, 0.0 }
 0x376   : > { %v702_v23 = vrot.slane %v701_v26, 2  ;;  %v662_v24 = vpop.permute.xlu1 %661  ;;  %v716_v25 = vrot.slane %v715_v19, 2  ;;  %v707_v28 = vrot.slane %v706_v20, 4  ;;  %v728_v29 = vrot.slane %v727_v22, 4 }
 0x377   : > { %v682_v30 = vmul.f32 %v662_v24, %v1354_v46  ;;  %v697_v31 = vrot.slane %v696_v18, 1  ;;  %v690_v33 = vrot.slane %v689_v41, 1 }
 0x378   : > { %v703_v32 = vadd.f32 %v702_v23, %v701_v26  ;;  %v708_v34 = vadd.f32 %v707_v28, %v706_v20  ;;  %v729_v50 = vadd.f32 %v728_v29, %v727_v22  ;;  %v717_v39 = vadd.f32 %v716_v25, %v715_v19 }
 0x379   : > { %v720_v35 = vsel %vm523_vm2, %v682_v30, 0.0  ;;  %v698_v45 = vadd.f32 %v697_v31, %v696_v18  ;;  %v691_v47 = vadd.f32 %v690_v33, %v689_v41 }
 0x37a   : > { %v704_v36 = vrot.slane %v703_v32, 1  ;;  %v721_v37 = vrot.slane %v720_v35, 4  ;;  %v676_v38 = vpop.permute.xlu1 %675  ;;  %v709_v40 = vrot.slane %v708_v34, 2  ;;  %v730_v42 = vrot.slane %v729_v50, 2 }
 0x37b   : > { %v684_v43 = vmul.f32 %v676_v38, %v1366_v54  ;;  %v718_v53 = vrot.slane %v717_v39, 1  ;;  %v749_v58 = vsel %vm591_vm3, %v698_v45, %v691_v47 }
 0x37c   : > { %v722_v44 = vadd.f32 %v721_v37, %v720_v35  ;;  %v710_v46 = vadd.f32 %v709_v40, %v708_v34  ;;  %v705_v49 = vadd.f32 %v704_v36, %v703_v32  ;;  %v731_v56 = vadd.f32 %v730_v42, %v729_v50 }
 0x37d   : > { %v734_v48 = vsel %vm523_vm2, %v684_v43, 0.0  ;;  %v719_v62 = vadd.f32 %v718_v53, %v717_v39 }
 0x37e   : > { %v723_v51 = vrot.slane %v722_v44, 2  ;;  %v735_v52 = vrot.slane %v734_v48, 4  ;;  %v711_v55 = vrot.slane %v710_v46, 1  ;;  %v750_v54 = vsel %vm593_vm4, %v705_v49, %v749_v58 }
 0x37f   : > { %v732_v0 = vrot.slane %v731_v56, 1 }
 0x380   : > { %v724_v17 = vadd.f32 %v723_v51, %v722_v44  ;;  %v736_v57 = vadd.f32 %v735_v52, %v734_v48  ;;  %v712_v59 = vadd.f32 %v711_v55, %v710_v46 }
 0x381   : > { %v733_v8 = vadd.f32 %v732_v0, %v731_v56 }
 0x382   : > { %v725_v60 = vrot.slane %v724_v17, 1  ;;  %v737_v61 = vrot.slane %v736_v57, 2  ;;  %v751_v63 = vsel %vm595_vm5, %v712_v59, %v750_v54 }
 0x383   : > { %v752_v3 = vsel %vm597_vm6, %v719_v62, %v751_v63 }
 0x384   : > { %v726_v1 = vadd.f32 %v725_v60, %v724_v17  ;;  %v738_v2 = vadd.f32 %v737_v61, %v736_v57 }
 0x386   : > { %v753_v4 = vsel %vm599_vm7, %v726_v1, %v752_v3  ;;  %v739_v5 = vrot.slane %v738_v2, 1 }
 0x387   : > { %v754_v9 = vsel %vm601_vm8, %v733_v8, %v753_v4 }
 0x388   : > { %v740_v7 = vadd.f32 %v739_v5, %v738_v2 }
 0x38a   : > { %v755_v10 = vsel %vm603_vm9, %v740_v7, %v754_v9 }
 0x38b   : > { %757 = vst.msk [vmem:[%s311_s12] sm:$0xff] %vm523_vm2, %v755_v10 }
 0x38c   : > { %1072 = shalt.err (!%p1069_p5)
}
 0x38d   : > { %s1073_s30 = scalar_lea.hbm %s1429_s15, 128  ;;  %s1077_s26 = scalar_lea.hbm %s1473_s5, 256 }
 0x38e   : > { %p1074_p2 = scmp.ne.s32.totalorder %s1429_s15, %s1073_s30  ;;  %p1078_p6 = scmp.lt.s32.totalorder %s1429_s15, %s1473_s5 }
 0x38f   : > { %p1079_p8 = scmp.lt.s32.totalorder %s1077_s26, %s1073_s30 }
 0x390   : > { %p1075_p1 = pnand %p1074_p2, %p1494_p7 }
 0x391   : > { %p1080_p3 = por %p1079_p8, %p1078_p6 }
 0x392   : > { %p1076_p4 = pneg %p1075_p1 }
 0x394   : > { %p1081_p11 = pnand %p1080_p3, %p1076_p4 }
 0x396   : > { %1084 = shalt.err (!%p1081_p11)
}
 0x397   : > { %945 = dma.vmem_to_hbm [thread:$0]  (%p1494_p7), %s778_s10, 128, %s1429_s15, %s760_s7  }
 0x398 PF: > { %s792_s12 = sand.u32 1, %s1115_s21   ;;  %p1495_p9 = scmp.ne.s32.totalorder %s1482_s28, 0 }
 0x399   : > { %p1496_p10 = scmp.ge.s32.totalorder %s1127_s24, 2  ;;  %s793_s27 = scalar_lea.sflag [#allocation4], %s792_s12 }
 0x39b   : > { %p956_p12 = pnand %p1496_p10, %p1495_p9 }
 0x39d   : > { %p957_p13 = pneg %p956_p12 }
 0x39f   : > { %1110 = dma.done.wait (%p957_p13), %s793_s27, 128  }
 0x3a0   : > { %1112 = vsyncadd (%p957_p13), %s793_s27, 4294967168  ;;  %p21_p0 = scmp.ge.s32.totalorder %s1226_s9, 4   ;;  %s1497_s21 = smov %s1119_s22 }
 0x3a1   : > { %s1498_s22 = smov %s1123_s23  ;;  %s1499_s23 = smov %s1246_s17 }
 0x3a2   : > { %s1500_s24 = smov %s1226_s9  ;;  %23 = sbr.rel (!%p21_p0) target bundleno = 6 (0x6), region = 107 }
 0x3a7   :  { %805 = vsyncpa [#allocation3], 1 }
 0x3a8   :  { %807 = vsyncpa [#allocation3 + $0x1], 1 }
 0x3a9   :  { %808 = vsyncpa [#allocation6], 1 }
 0x3aa   :  { %809 = vsyncpa [#allocation4], 1 }
 0x3ab   :  { %811 = vsyncpa [#allocation4 + $0x1], 1 }

</bundles_post_ra>
